<compile_context>
chip_gen: v6e
topology: v6e:2x2x1
jax: 0.10.0
libtpu: 0.0.40
codegen_flags: <defaults>
</compile_context>

<pallas_src>
import functools

import jax
import jax.numpy as jnp
import numpy as np
from jax.experimental import pallas as pl
from jax.experimental.pallas import tpu as pltpu

NEG_SLOPE = 0.01  # PyTorch F.leaky_relu default


def _leaky_relu(x):
    return jnp.where(x > 0, x, NEG_SLOPE * x)


def _round_up(x, m):
    return ((x + m - 1) // m) * m


def _encoder_kernel(x_ref, w1_ref, b1_ref, w2_ref, b2_ref, out_ref,
                    *, symmetric_type, num_children):
    tb_c, _ = x_ref.shape                       # (tb*C, D_in)
    c = num_children
    tb = tb_c // c
    h_dim = w1_ref.shape[1]

    # ---- First linear: one big MXU matmul, bf16 operands, f32 accumulate ----
    x = x_ref[...].astype(jnp.bfloat16)                       # cast in-kernel
    h = jnp.dot(x, w1_ref[...], preferred_element_type=jnp.float32)
    h = _leaky_relu(h + b1_ref[...])                          # (tb*C, H) f32

    # ---- Symmetric reduction over the children axis (f32) ----
    # f32 sublane tile is 8, so this reshape is a cheap re-grouping for C=8.
    h = h.reshape(tb, c, h_dim)                               # (tb, C, H)
    if symmetric_type == 'max':
        p = jnp.max(h, axis=1)                                # (tb, H)
    elif symmetric_type == 'sum':
        p = jnp.sum(h, axis=1)
    elif symmetric_type == 'avg':
        p = jnp.sum(h, axis=1) * (1.0 / c)
    else:
        raise ValueError(f'Unknown symmetric type: {symmetric_type}')

    # ---- Second linear + leaky_relu, lane/sublane-dense (tb, F) store ----
    o = jnp.dot(p.astype(w2_ref.dtype), w2_ref[...],
                preferred_element_type=jnp.float32)
    o = _leaky_relu(o + b2_ref[...])                          # (tb, F)
    out_ref[...] = o.astype(out_ref.dtype)


def template_children_encoder(child_feats, w1, b1, w2, b2, *, symmetric_type,
                              block_b=1024):
    """child_feats: (B, C, D_in); w1: (H, D_in); b1: (H,); w2: (F, H); b2: (F,)."""
    B, C, D_in = child_feats.shape
    H = w1.shape[0]
    F_out = w2.shape[0]

    # Batch tile: multiple of 8 (sublane tile). Large enough that per-step HBM
    # traffic dwarfs the ~0.35 us grid-step overhead, small enough for v7x VMEM.
    tb = min(block_b, _round_up(B, 8))
    # v7x has 2 TensorCores: keep >= 2 "parallel" grid steps when B is large.
    if B >= 256 and pl.cdiv(B, tb) < 2:
        tb = max(8, _round_up(pl.cdiv(B, 2), 8))
    grid = pl.cdiv(B, tb)

    # Free reshape of the contiguous input (no HBM pass): kernel sees 2-D rows.
    x_flat = child_feats.reshape(B * C, D_in)

    # Tiny weights/biases: cast/transpose in the wrapper (negligible traffic),
    # constant index_maps keep them resident in VMEM across the whole grid.
    w1_t = jnp.asarray(w1, jnp.bfloat16).T                    # (D_in, H)
    w2_t = jnp.asarray(w2, jnp.bfloat16).T                    # (H, F)
    b1_2d = jnp.asarray(b1, jnp.float32).reshape(1, H)
    b2_2d = jnp.asarray(b2, jnp.float32).reshape(1, F_out)

    kernel = functools.partial(
        _encoder_kernel, symmetric_type=symmetric_type, num_children=C)

    in_bytes = int(np.dtype(child_feats.dtype).itemsize)
    cost = pl.CostEstimate(
        flops=2 * B * C * D_in * H + 2 * B * H * F_out,
        transcendentals=0,
        bytes_accessed=(B * C * D_in * in_bytes + B * F_out * in_bytes
                        + (D_in * H + H * F_out) * 2 + (H + F_out) * 4),
    )

    out = pl.pallas_call(
        kernel,
        out_shape=jax.ShapeDtypeStruct((B, F_out), child_feats.dtype),
        grid=(grid,),
        in_specs=[
            pl.BlockSpec((tb * C, D_in), lambda i: (i, 0)),    # child rows tile
            pl.BlockSpec((D_in, H), lambda i: (0, 0)),         # W1^T (resident)
            pl.BlockSpec((1, H), lambda i: (0, 0)),            # b1
            pl.BlockSpec((H, F_out), lambda i: (0, 0)),        # W2^T (resident)
            pl.BlockSpec((1, F_out), lambda i: (0, 0)),        # b2
        ],
        out_specs=pl.BlockSpec((tb, F_out), lambda i: (i, 0)),
        compiler_params=pltpu.CompilerParams(
            dimension_semantics=("parallel",),
            vmem_limit_bytes=48 * 1024 * 1024),
        cost_estimate=cost,
    )(x_flat, w1_t, b1_2d, w2_t, b2_2d)

    return out


def _reference(child_feats, w1, b1, w2, b2, symmetric_type):
    h = child_feats @ w1.T + b1
    h = jnp.where(h > 0, h, NEG_SLOPE * h)
    if symmetric_type == 'max':
        p = h.max(axis=1)
    elif symmetric_type == 'sum':
        p = h.sum(axis=1)
    else:
        p = h.mean(axis=1)
    o = p @ w2.T + b2
    return jnp.where(o > 0, o, NEG_SLOPE * o)


if __name__ == "__main__":
    # Module config (synthetic, deterministic): feat_len=32, Tree.num_sem=4,
    # max_part_per_parent=4 -> D_in = 40; hidden_len = 32.
    feat_len = 32
    num_sem = 4
    max_part_per_parent = 4
    hidden_len = 32
    D_in = feat_len + num_sem + max_part_per_parent   # 40

    key = jax.random.PRNGKey(0)
    k_x, k_w1, k_b1, k_w2, k_b2 = jax.random.split(key, 5)

    # nn.Linear-style init (uniform in +-1/sqrt(fan_in)), deterministic.
    w1 = jax.random.uniform(k_w1, (hidden_len, D_in), jnp.float32,
                            -1.0 / np.sqrt(D_in), 1.0 / np.sqrt(D_in))
    b1 = jax.random.uniform(k_b1, (hidden_len,), jnp.float32,
                            -1.0 / np.sqrt(D_in), 1.0 / np.sqrt(D_in))
    w2 = jax.random.uniform(k_w2, (feat_len, hidden_len), jnp.float32,
                            -1.0 / np.sqrt(hidden_len), 1.0 / np.sqrt(hidden_len))
    b2 = jax.random.uniform(k_b2, (feat_len,), jnp.float32,
                            -1.0 / np.sqrt(hidden_len), 1.0 / np.sqrt(hidden_len))

    # (B, C, block_b): tiny default case + a multi-block ragged case.
    for (B, C, blk) in ((2, 8, 1024), (20, 8, 8)):
        x = jax.random.normal(k_x, (B, C, D_in), dtype=jnp.float32)
        for symmetric_type in ('max', 'sum', 'avg'):
            out = template_children_encoder(x, w1, b1, w2, b2,
                                            symmetric_type=symmetric_type,
                                            block_b=blk)
            out = jax.block_until_ready(out)

            ref = _reference(x, w1, b1, w2, b2, symmetric_type)
            # bf16 MXU operands (f32 accumulation) -> bf16-level tolerance.
            np.testing.assert_allclose(np.asarray(out), np.asarray(ref),
                                       rtol=5e-2, atol=5e-2)

    print("KERNEL_OK")
</pallas_src>

<mosaic_0001>
module attributes {stable_mosaic.version = 11 : i64} {
  func.func @_encoder_kernel(%arg0: i32, %arg1: memref<64x40xf32, #tpu.memory_space<vmem>>, %arg2: memref<40x32xbf16, #tpu.memory_space<vmem>>, %arg3: memref<1x32xf32, #tpu.memory_space<vmem>>, %arg4: memref<32x32xbf16, #tpu.memory_space<vmem>>, %arg5: memref<1x32xf32, #tpu.memory_space<vmem>>, %arg6: memref<8x32xf32, #tpu.memory_space<vmem>>) attributes {dimension_semantics = [#tpu.dimension_semantics<parallel>], iteration_bounds = array<i64: 1>, scalar_prefetch = 0 : i64, scratch_operands = 0 : i64, tpu.core_type = #tpu.core_type<tc>, window_params = [{transform_indices = @transform_0, window_bounds = array<i64: 64, 40>}, {pipeline_mode = #tpu.pipeline_mode<synchronous>, transform_indices = @transform_1, window_bounds = array<i64: 40, 32>}, {pipeline_mode = #tpu.pipeline_mode<synchronous>, transform_indices = @transform_2, window_bounds = array<i64: 1, 32>}, {pipeline_mode = #tpu.pipeline_mode<synchronous>, transform_indices = @transform_3, window_bounds = array<i64: 32, 32>}, {pipeline_mode = #tpu.pipeline_mode<synchronous>, transform_indices = @transform_4, window_bounds = array<i64: 1, 32>}, {transform_indices = @transform_5, window_bounds = array<i64: 8, 32>}]} {
    %c0 = arith.constant 0 : index
    %c0_0 = arith.constant 0 : index
    %0 = vector.load %arg1[%c0, %c0_0] : memref<64x40xf32, #tpu.memory_space<vmem>>, vector<64x40xf32>
    %1 = arith.truncf %0 : vector<64x40xf32> to vector<64x40xbf16>
    %c0_1 = arith.constant 0 : index
    %c0_2 = arith.constant 0 : index
    %2 = vector.load %arg2[%c0_1, %c0_2] : memref<40x32xbf16, #tpu.memory_space<vmem>>, vector<40x32xbf16>
    %cst = arith.constant dense<0.000000e+00> : vector<64x32xf32>
    %3 = tpu.matmul %1, %2, %cst {dimension_numbers = #tpu.dot_dimension_numbers<[1], [0], [0], [1], [0, 0, 1, 1], [], []>} : vector<64x40xbf16>, vector<40x32xbf16>, vector<64x32xf32> -> vector<64x32xf32>
    %c0_3 = arith.constant 0 : index
    %c0_4 = arith.constant 0 : index
    %4 = vector.load %arg3[%c0_3, %c0_4] : memref<1x32xf32, #tpu.memory_space<vmem>>, vector<1x32xf32>
    %5 = vector.broadcast %4 : vector<1x32xf32> to vector<64x32xf32>
    %6 = arith.addf %3, %5 : vector<64x32xf32>
    %cst_5 = arith.constant 0.000000e+00 : f32
    %7 = vector.broadcast %cst_5 : f32 to vector<64x32xf32>
    %8 = arith.cmpf ogt, %6, %7 : vector<64x32xf32>
    %cst_6 = arith.constant 0.00999999977 : f32
    %9 = vector.broadcast %cst_6 : f32 to vector<64x32xf32>
    %10 = arith.mulf %9, %6 : vector<64x32xf32>
    %11 = arith.select %8, %6, %10 : vector<64x32xi1>, vector<64x32xf32>
    %12 = vector.shape_cast %11 : vector<64x32xf32> to vector<8x8x32xf32>
    %cst_7 = arith.constant dense<0xFF800000> : vector<8x32xf32>
    %13 = vector.multi_reduction <maximumf>, %12, %cst_7 [1] : vector<8x8x32xf32> to vector<8x32xf32>
    %14 = arith.truncf %13 : vector<8x32xf32> to vector<8x32xbf16>
    %c0_8 = arith.constant 0 : index
    %c0_9 = arith.constant 0 : index
    %15 = vector.load %arg4[%c0_8, %c0_9] : memref<32x32xbf16, #tpu.memory_space<vmem>>, vector<32x32xbf16>
    %cst_10 = arith.constant dense<0.000000e+00> : vector<8x32xf32>
    %16 = tpu.matmul %14, %15, %cst_10 {dimension_numbers = #tpu.dot_dimension_numbers<[1], [0], [0], [1], [0, 0, 1, 1], [], []>} : vector<8x32xbf16>, vector<32x32xbf16>, vector<8x32xf32> -> vector<8x32xf32>
    %c0_11 = arith.constant 0 : index
    %c0_12 = arith.constant 0 : index
    %17 = vector.load %arg5[%c0_11, %c0_12] : memref<1x32xf32, #tpu.memory_space<vmem>>, vector<1x32xf32>
    %18 = vector.broadcast %17 : vector<1x32xf32> to vector<8x32xf32>
    %19 = arith.addf %16, %18 : vector<8x32xf32>
    %cst_13 = arith.constant 0.000000e+00 : f32
    %20 = vector.broadcast %cst_13 : f32 to vector<8x32xf32>
    %21 = arith.cmpf ogt, %19, %20 : vector<8x32xf32>
    %cst_14 = arith.constant 0.00999999977 : f32
    %22 = vector.broadcast %cst_14 : f32 to vector<8x32xf32>
    %23 = arith.mulf %22, %19 : vector<8x32xf32>
    %24 = arith.select %21, %19, %23 : vector<8x32xi1>, vector<8x32xf32>
    %c0_15 = arith.constant 0 : index
    %c0_16 = arith.constant 0 : index
    %25 = vector.load %arg6[%c0_15, %c0_16] : memref<8x32xf32, #tpu.memory_space<vmem>>, vector<8x32xf32>
    tpu.vector_store %arg6[%c0_15, %c0_16], %24 {strides = array<i32>} : memref<8x32xf32, #tpu.memory_space<vmem>>, vector<8x32xf32>,
    return
  }
  func.func @transform_0(%arg0: i32) -> (i32, i32) {
    %c0_i32 = arith.constant 0 : i32
    %c0_i32_0 = arith.constant 0 : i32
    return %arg0, %c0_i32 : i32, i32
  }
  func.func @transform_1(%arg0: i32) -> (i32, i32) {
    %c0_i32 = arith.constant 0 : i32
    %c0_i32_0 = arith.constant 0 : i32
    %c0_i32_1 = arith.constant 0 : i32
    return %c0_i32, %c0_i32_0 : i32, i32
  }
  func.func @transform_2(%arg0: i32) -> (i32, i32) {
    %c0_i32 = arith.constant 0 : i32
    %c0_i32_0 = arith.constant 0 : i32
    %c0_i32_1 = arith.constant 0 : i32
    return %c0_i32, %c0_i32_0 : i32, i32
  }
  func.func @transform_3(%arg0: i32) -> (i32, i32) {
    %c0_i32 = arith.constant 0 : i32
    %c0_i32_0 = arith.constant 0 : i32
    %c0_i32_1 = arith.constant 0 : i32
    return %c0_i32, %c0_i32_0 : i32, i32
  }
  func.func @transform_4(%arg0: i32) -> (i32, i32) {
    %c0_i32 = arith.constant 0 : i32
    %c0_i32_0 = arith.constant 0 : i32
    %c0_i32_1 = arith.constant 0 : i32
    return %c0_i32, %c0_i32_0 : i32, i32
  }
  func.func @transform_5(%arg0: i32) -> (i32, i32) {
    %c0_i32 = arith.constant 0 : i32
    %c0_i32_0 = arith.constant 0 : i32
    return %arg0, %c0_i32 : i32, i32
  }
}

</mosaic_0001>

<bundles_post_ra>
// kernel: tpu_custom_call.1
= control target key start
LH: loop header
LB: loop body
LE: loop exit
PB: predicated region body
PF: predicated region fallthrough
CT: control target
= control target key end

     0   :  { %10 = vsyncpa [#allocation3], 0  ;;  %vm74_vm0 = vcmask 1043456   ;;  %vm61_vm1 = vcmask 326656   ;;  %v426_v17 = vmov 0.0   ;;  %vm427_vm2 = vmmov 0   ;;  %s533_s0 = inlined_call_operand.vmem [shape: f32[16,40], index: 0, kind: input, shape index: {}]   ;;  %s534_s1 = inlined_call_operand.vmem [shape: bf16[40,32], index: 1, kind: input, shape index: {}]   ;;  %s535_s2 = inlined_call_operand.vmem [shape: f32[1,32], index: 2, kind: input, shape index: {}]   ;;  %s536_s3 = inlined_call_operand.vmem [shape: bf16[32,32], index: 3, kind: input, shape index: {}]   ;;  %s537_s4 = inlined_call_operand.vmem [shape: f32[1,32], index: 4, kind: input, shape index: {}]   ;;  %s538_s5 = inlined_call_operand.hbm [shape: f32[2,32], index: 5, kind: output, shape index: {}]  }
   0x1   :  { %v399_v0 = vld [vmem:[%s534_s1 + $0x10] ss:$0 sps:$4 sm:$0xff]   ;;  %v400_v1 = vld [vmem:[%s534_s1 + $0x8] sm:$0xff]   ;;  %v22_v3 = vld [vmem:[%s533_s0] sm:$0xff]  ;;  %385 = vmatprep.subr.bf16.mxu1 %v426_v17  ;;  %389 = vmatprep.mubr.msk.bf16.mxu1 %vm427_vm2, %v426_v17  ;;  %vm167_vm4 = vcmask 261120   ;;  %vm259_vm12 = vcmask 1041409  }
   0x2   :  { %393 = vmatprep.subr.msk.bf16.mxu0 %vm74_vm0, %v399_v0  ;;  %v76_v2 = vsel %vm74_vm0, %v399_v0, 0  ;;  %v23_v4 = vld [vmem:[%s533_s0 + $0x8] sm:$0xff]  ;;  %v401_v5 = vld [vmem:[%s534_s1] sm:$0xff]   ;;  %v24_v7 = vld [vmem:[%s533_s0 + $0x10] sm:$0xff]  ;;  %vm261_vm13 = vcmask 1042434   ;;  %vm263_vm14 = vcmask 1043459  }
   0x3   :  { %372 = vmatpush3.bf16.msra.mxu0 %v76_v2  ;;  %v30_v6 = vpack.c.bf16 %v23_v4, %v22_v3  ;;  %v25_v8 = vld [vmem:[%s533_s0 + $0x18] sm:$0xff]  ;;  %v26_v9 = vld [vmem:[%s533_s0 + $0x20] sm:$0xff]  ;;  %v27_v10 = vld [vmem:[%s533_s0 + $0x28] sm:$0xff]  ;;  %vm265_vm15 = vcmask 1044484   ;;  %vm267_vm0 = vcmask 1045509   ;;  %vm271_vm2 = vcmask 1047559  }
   0x4   :  { %373 = vmatprep.subr.bf16.mxu0 %v400_v1  ;;  %v31_v11 = vpack.c.bf16 %v25_v8, %v24_v7  ;;  %v32_v12 = vpack.c.bf16 %v27_v10, %v26_v9  ;;  %v28_v13 = vld [vmem:[%s533_s0 + $0x30] sm:$0xff]  ;;  %v29_v14 = vld [vmem:[%s533_s0 + $0x38] sm:$0xff]  ;;  %v402_v16 = vld [vmem:[%s536_s3 + $0x8] sm:$0xff]  }
   0x5   :  { %377 = vmatprep.mubr.msk.bf16.mxu0 %vm61_vm1, %v30_v6  ;;  %v33_v15 = vpack.c.bf16 %v29_v14, %v28_v13  ;;  %386 = vmatpush3.bf16.msra.mxu1 %v402_v16  ;;  %v403_v18 = vld [vmem:[%s536_s3] sm:$0xff]  }
   0x6   :  { %387 = vmatprep.subr.bf16.mxu1 %v426_v17  ;;  %v507_v19 = vld [vmem:[%s535_s2] ss:$0 sm:$0xff] }
   0x7   :  { %374 = vmatpush3.bf16.msra.mxu0 %v400_v1 }
   0x8   :  { %375 = vmatprep.subr.bf16.mxu0 %v401_v5 }
   0x9   :  { %388 = vmatpush3.bf16.msra.mxu1 %v403_v18 }
   0xb   :  { %376 = vmatpush3.bf16.msra.mxu0 %v401_v5 }
   0xe   :  { %378 = vmatmul.mubr.msk.bf16.vlgmr.msra.gmra.mxu0 %vm61_vm1, %v31_v11 }
   0xf   :  { %381 = vmatprep.mubr.msk.bf16.mxu0 %vm61_vm1, %v32_v12 }
  0x16   :  { %382 = vmatmul.mubr.msk.bf16.gmra.mxu0 %vm61_vm1, %v33_v15  ;;  %vm269_vm1 = vcmask 1046534  }
  0xce   :  { %v379_v20 = vpop.f32.mrf.mxu0 }
  0xcf   :  { %v121_v21 = vadd.f32 %v379_v20, %v507_v19 }
  0xd0   :  { %v112_v22 = vpop.f32.mrf.mxu0 }
  0xd1   :  { %vm145_vm3 = vcmp.gt.f32.partialorder %v121_v21, 0.0  ;;  %v153_v23 = vmul.f32 0.01, %v121_v21  ;;  %v113_v24 = vadd.f32 %v507_v19, %v112_v22 }
  0xd2   :  { %v380_v25 = vpop.f32.mrf.mxu0 }
  0xd3   :  { %v161_v26 = vsel %vm145_vm3, %v121_v21, %v153_v23  ;;  %vm143_vm5 = vcmp.gt.f32.partialorder %v113_v24, 0.0  ;;  %v151_v27 = vmul.f32 0.01, %v113_v24  ;;  %v124_v28 = vadd.f32 %v380_v25, %v507_v19 }
  0xd4   :  { %v182_v29 = vsel %vm167_vm4, %v161_v26, -inf  ;;  %v115_v30 = vpop.f32.mrf.mxu0 }
  0xd5   :  { %v183_v31 = vrot.slane %v182_v29, 4  ;;  %v159_v32 = vsel %vm143_vm5, %v113_v24, %v151_v27  ;;  %vm146_vm6 = vcmp.gt.f32.partialorder %v124_v28, 0.0  ;;  %v154_v33 = vmul.f32 0.01, %v124_v28 }
  0xd6   :  { %v168_v34 = vsel %vm167_vm4, %v159_v32, -inf  ;;  %v116_v35 = vadd.f32 %v507_v19, %v115_v30  ;;  %v383_v36 = vpop.f32.mrf.mxu0 }
  0xd7   :  { %v184_v37 = vmax.f32 %v182_v29, %v183_v31  ;;  %v169_v38 = vrot.slane %v168_v34, 4  ;;  %v162_v39 = vsel %vm146_vm6, %v124_v28, %v154_v33  ;;  %v137_v40 = vadd.f32 %v383_v36, %v507_v19 }
  0xd8   :  { %v189_v41 = vsel %vm167_vm4, %v162_v39, -inf  ;;  %vm144_vm7 = vcmp.gt.f32.partialorder %v116_v35, 0.0  ;;  %v152_v42 = vmul.f32 0.01, %v116_v35  ;;  %v128_v43 = vpop.f32.mrf.mxu0 }
  0xd9   :  { %v170_v44 = vmax.f32 %v168_v34, %v169_v38  ;;  %v190_v45 = vrot.slane %v189_v41, 4  ;;  %vm149_vm8 = vcmp.gt.f32.partialorder %v137_v40, 0.0  ;;  %v157_v47 = vmul.f32 0.01, %v137_v40 }
  0xda   :  { %v160_v46 = vsel %vm144_vm7, %v116_v35, %v152_v42  ;;  %v129_v48 = vadd.f32 %v507_v19, %v128_v43  ;;  %v185_v49 = vrot.slane %v184_v37, 2  ;;  %v384_v53 = vpop.f32.mrf.mxu0 }
  0xdb   :  { %v171_v50 = vrot.slane %v170_v44, 2  ;;  %v191_v51 = vmax.f32 %v189_v41, %v190_v45  ;;  %v175_v52 = vsel %vm167_vm4, %v160_v46, -inf  ;;  %v165_v55 = vsel %vm149_vm8, %v137_v40, %v157_v47 }
  0xdc   :  { %v176_v54 = vrot.slane %v175_v52, 4  ;;  %vm147_vm9 = vcmp.gt.f32.partialorder %v129_v48, 0.0  ;;  %v155_v56 = vmul.f32 0.01, %v129_v48  ;;  %v210_v58 = vsel %vm167_vm4, %v165_v55, -inf  ;;  %v131_v1 = vpop.f32.mrf.mxu0 }
  0xdd   :  { %v172_v57 = vmax.f32 %v170_v44, %v171_v50  ;;  %v211_v60 = vrot.slane %v210_v58, 4  ;;  %v140_v62 = vadd.f32 %v384_v53, %v507_v19  ;;  %v186_v63 = vmax.f32 %v184_v37, %v185_v49 }
  0xde   :  { %v177_v59 = vmax.f32 %v175_v52, %v176_v54  ;;  %v163_v61 = vsel %vm147_vm9, %v129_v48, %v155_v56  ;;  %v192_v2 = vrot.slane %v191_v51, 2  ;;  %v132_v10 = vadd.f32 %v507_v19, %v131_v1 }
  0xdf   :  { %v196_v0 = vsel %vm167_vm4, %v163_v61, -inf  ;;  %vm150_vm10 = vcmp.gt.f32.partialorder %v140_v62, 0.0  ;;  %v212_v5 = vmax.f32 %v210_v58, %v211_v60  ;;  %v158_v6 = vmul.f32 0.01, %v140_v62 }
  0xe0   :  { %v178_v3 = vrot.slane %v177_v59, 2  ;;  %v197_v4 = vrot.slane %v196_v0, 4  ;;  %v173_v7 = vrot.slane %v172_v57, 1  ;;  %v187_v11 = vrot.slane %v186_v63, 1 }
  0xe1   :  { %v166_v12 = vsel %vm150_vm10, %v140_v62, %v158_v6  ;;  %v193_v13 = vmax.f32 %v191_v51, %v192_v2  ;;  %v213_v17 = vrot.slane %v212_v5, 2  ;;  %vm148_vm11 = vcmp.gt.f32.partialorder %v132_v10, 0.0 }
  0xe2   :  { %v179_v8 = vmax.f32 %v177_v59, %v178_v3  ;;  %v198_v9 = vmax.f32 %v196_v0, %v197_v4  ;;  %v217_v16 = vsel %vm167_vm4, %v166_v12, -inf  ;;  %v174_v20 = vmax.f32 %v172_v57, %v173_v7  ;;  %v357_v4 = vld [vmem:[%s537_s4] ss:$0 sm:$0xff] }
  0xe3   :  { %v218_v18 = vrot.slane %v217_v16, 4  ;;  %v156_v23 = vmul.f32 0.01, %v132_v10  ;;  %v188_v25 = vmax.f32 %v186_v63, %v187_v11  ;;  %v194_v26 = vrot.slane %v193_v13, 1 }
  0xe4   :  { %v180_v14 = vrot.slane %v179_v8, 1  ;;  %v199_v15 = vrot.slane %v198_v9, 2  ;;  %v214_v19 = vmax.f32 %v212_v5, %v213_v17  ;;  %v224_v32 = vpack.c.bf16 %v174_v20, %v174_v20 }
  0xe5   :  { %v219_v24 = vmax.f32 %v217_v16, %v218_v18  ;;  %v164_v28 = vsel %vm148_vm11, %v132_v10, %v156_v23  ;;  %v195_v35 = vmax.f32 %v193_v13, %v194_v26  ;;  %v226_v38 = vpack.c.bf16 %v188_v25, %v188_v25 }
  0xe6   :  { %v181_v21 = vmax.f32 %v179_v8, %v180_v14  ;;  %v200_v22 = vmax.f32 %v198_v9, %v199_v15  ;;  %v203_v31 = vsel %vm167_vm4, %v164_v28, -inf  ;;  %v215_v39 = vrot.slane %v214_v19, 1 }
  0xe7   :  { %v220_v30 = vrot.slane %v219_v24, 2  ;;  %v204_v33 = vrot.slane %v203_v31, 4  ;;  %v251_v41 = vunpack.c.l.b16 %v224_v32  ;;  %v227_v44 = vpack.c.bf16 %v195_v35, %v195_v35 }
  0xe8   :  { %v225_v27 = vpack.c.bf16 %v181_v21, %v181_v21  ;;  %v201_v29 = vrot.slane %v200_v22, 1  ;;  %v253_v47 = vunpack.c.l.b16 %v226_v38  ;;  %v216_v48 = vmax.f32 %v214_v19, %v215_v39 }
  0xe9   :  { %v221_v34 = vmax.f32 %v219_v24, %v220_v30  ;;  %v205_v37 = vmax.f32 %v203_v31, %v204_v33  ;;  %v254_v53 = vunpack.c.l.b16 %v227_v44 }
  0xea   :  { %v252_v36 = vunpack.c.l.b16 %v225_v27  ;;  %v202_v40 = vmax.f32 %v200_v22, %v201_v29  ;;  %v230_v55 = vpack.c.bf16 %v216_v48, %v216_v48 }
  0xeb   :  { %v222_v42 = vrot.slane %v221_v34, 1  ;;  %v206_v43 = vrot.slane %v205_v37, 2 }
  0xec   :  { %v260_v45 = vsel %vm259_vm12, %v252_v36, %v251_v41  ;;  %v228_v49 = vpack.c.bf16 %v202_v40, %v202_v40  ;;  %v257_v61 = vunpack.c.l.b16 %v230_v55 }
  0xed   :  { %v207_v46 = vmax.f32 %v205_v37, %v206_v43  ;;  %v223_v50 = vmax.f32 %v221_v34, %v222_v42  ;;  %v262_v52 = vsel %vm261_vm13, %v253_v47, %v260_v45 }
  0xee   :  { %v255_v56 = vunpack.c.l.b16 %v228_v49  ;;  %v264_v59 = vsel %vm263_vm14, %v254_v53, %v262_v52 }
  0xef   :  { %v208_v51 = vrot.slane %v207_v46, 1  ;;  %v231_v57 = vpack.c.bf16 %v223_v50, %v223_v50 }
  0xf0   :  { %v266_v62 = vsel %vm265_vm15, %v255_v56, %v264_v59 }
  0xf1   :  { %v209_v54 = vmax.f32 %v207_v46, %v208_v51  ;;  %v258_v63 = vunpack.c.l.b16 %v231_v57 }
  0xf3   :  { %v229_v58 = vpack.c.bf16 %v209_v54, %v209_v54 }
  0xf5   :  { %v256_v60 = vunpack.c.l.b16 %v229_v58 }
  0xf7   :  { %v268_v0 = vsel %vm267_vm0, %v256_v60, %v266_v62 }
  0xf8   :  { %v270_v1 = vsel %vm269_vm1, %v257_v61, %v268_v0 }
  0xf9   :  { %v272_v2 = vsel %vm271_vm2, %v258_v63, %v270_v1 }
  0xfa   :  { %v273_v3 = vpack.c.b16 %v272_v2, %v272_v2 }
  0xfc   :  { %390 = vmatmul.mubr.msk.bf16.vlgmr.msra.gmra.mxu1 %vm167_vm4, %v273_v3 }
 0x1bc   :  { %v323_v5 = vpop.f32.mrf.mxu1 }
 0x1bd   :  { %v324_v6 = vadd.f32 %v357_v4, %v323_v5 }
 0x1be   :  { %v391_v7 = vpop.f32.mrf.mxu1 }
 0x1bf   :  { %vm329_vm3 = vcmp.gt.f32.partialorder %v324_v6, 0.0  ;;  %v330_v8 = vmul.f32 0.01, %v324_v6 }
 0x1c0   :  { %v326_v9 = vpop.f32.mrf.mxu1 }
 0x1c1   :  { %v331_v10 = vsel %vm329_vm3, %v324_v6, %v330_v8 }
 0x1c2   :  { %332 = vst.msk [vmem:[#allocation2] sm:$0xff] %vm167_vm4, %v331_v10  ;;  %v392_v11 = vpop.f32.mrf.mxu1 }
 0x1c3   :  { %337 = vsyncadd [#allocation3], 96  ;;  %s428_s19 = smov [#allocation2]  }
 0x1c4   :  { %s338_s20 = sshll.u32 %s428_s19, 4  ;;  %s339_s20 = int_to_ptr.vmem [resolvable:$true] %s338_s20 }
 0x1c5   :  { %s404_s21 = scalar_lea.vmem %s339_s20, 32  ;;  %s408_s22 = scalar_lea.vmem %s339_s20, 128 }
 0x1c6   :  { %p405_p0 = scmp.ne.s32.totalorder %s339_s20, %s404_s21  ;;  %p409_p1 = scmp.lt.s32.totalorder %s339_s20, %s339_s20 }
 0x1c7   :  { %p410_p2 = scmp.lt.s32.totalorder %s408_s22, %s404_s21 }
 0x1c9   :  { %p411_p3 = por %p410_p2, %p409_p1 }
 0x1cb   :  { %p412_p4 = pnand %p411_p3, %p405_p0 }
 0x1cd   :  { %415 = shalt.err (!%p412_p4)
}
 0x1ce   :  { %s429_s4 = smov 32   ;;  %s430_s23 = smov 2  }
 0x1cf   :  { %344 = dma.vmem_to_hbm [thread:$0]  %s339_s20, 32, %s538_s5, [#allocation3], %s429_s4, %s429_s4, %s430_s23  }
 0x1d0   :  { %424 = dma.done.wait [#allocation3], 128  }
 0x1d1   :  { %425 = vsyncadd [#allocation3], 4294967168 }
 0x1d2   :  { %348 = vsyncpa [#allocation3], 1 }

</bundles_post_ra>
